<compile_context>
chip_gen: v7x
topology: tpu7x:2x2x1
jax: 0.10.0
libtpu: 0.0.40
codegen_flags: <defaults>
</compile_context>

<pallas_src>
import functools
import numpy as np
import jax
import jax.numpy as jnp
from jax import lax
from jax.experimental import pallas as pl
from jax.experimental.pallas import tpu as pltpu

EPS = 1e-5


# --------------------------------- kernels ------------------------------------
def _make_conv1_proj_kernel(plan1, plan_sc, n_phases, Ho):
    """conv1 (3x3, stride s) + projection conv (1x1, stride s) + BN partial stats.

    Inputs are per-image row-phase slabs of the zero-padded activation with a
    fused (width*Cin) lane axis.  Each kh tap is one matmul against a banded
    weight matrix; the row stride is handled by the phase decomposition, the
    column stride/padding by the band.
    """
    def kernel(*refs):
        x_ph = refs[:n_phases]                  # row-phase activation slabs
        w1_ref = refs[n_phases]                 # (3, Wp*Cin, Wo*Cout)
        wp_ref = refs[n_phases + 1]             # (Wp*Cin, Wo*Cout)
        y1_ref, ysc_ref, st_ref = refs[n_phases + 2:]

        y1 = None
        for kh, (ph, off) in enumerate(plan1):
            xs = x_ph[ph][pl.ds(off, Ho), :]
            t = jnp.dot(xs, w1_ref[kh], preferred_element_type=jnp.float32)
            y1 = t if y1 is None else y1 + t

        xsc = x_ph[plan_sc[0]][pl.ds(plan_sc[1], Ho), :]
        ysc = jnp.dot(xsc, wp_ref[...], preferred_element_type=jnp.float32)

        y1_ref[...] = y1
        ysc_ref[...] = ysc
        # per-(wo, channel) partial sum / sum-of-squares; rows reduced here so
        # only a tiny (4, Wo*Cout) slab per image goes back to HBM.
        st_ref[...] = jnp.concatenate(
            [jnp.sum(y1, axis=0, keepdims=True),
             jnp.sum(y1 * y1, axis=0, keepdims=True),
             jnp.sum(ysc, axis=0, keepdims=True),
             jnp.sum(ysc * ysc, axis=0, keepdims=True)], axis=0)
    return kernel


def _make_bn_relu_conv2_kernel(Ho, compute_dtype):
    """bn1 (precomputed scale/bias) + ReLU + conv2 (3x3 stride 1) + BN2 partials."""
    def kernel(y1_ref, sb1_ref, w2_ref, y2_ref, st_ref):
        sb1 = sb1_ref[...]                                       # (2, Wo*Cout)
        a1 = jnp.maximum(y1_ref[...] * sb1[0:1, :] + sb1[1:2, :], 0.0)
        zrow = jnp.zeros((1, a1.shape[1]), jnp.float32)
        a_pad = jnp.concatenate([zrow, a1, zrow], axis=0).astype(compute_dtype)
        y2 = None
        for kh in range(3):                                      # 3 row-shifted taps
            t = jnp.dot(a_pad[kh:kh + Ho, :], w2_ref[kh],
                        preferred_element_type=jnp.float32)
            y2 = t if y2 is None else y2 + t
        y2_ref[...] = y2
        st_ref[...] = jnp.concatenate(
            [jnp.sum(y2, axis=0, keepdims=True),
             jnp.sum(y2 * y2, axis=0, keepdims=True)], axis=0)
    return kernel


def _bn_add_relu_kernel(y2_ref, ysc_ref, sb2_ref, sbp_ref, o_ref):
    """bn2 + projection-bn + residual add + ReLU (elementwise epilogue)."""
    sb2 = sb2_ref[...]
    sbp = sbp_ref[...]
    o = (y2_ref[...] * sb2[0:1, :] + sb2[1:2, :]
         + ysc_ref[...] * sbp[0:1, :] + sbp[1:2, :])
    o_ref[...] = jnp.maximum(o, 0.0)


# ------------------------------- host-side glue --------------------------------
def _band_mask(K, P, Q, stride, base):
    """mask[kw, p, q] = 1  iff  p == base + stride*q + kw  and 0 <= p < P."""
    m = np.zeros((K, P, Q), np.float32)
    for kw in range(K):
        for q in range(Q):
            p = base + stride * q + kw
            if 0 <= p < P:
                m[kw, p, q] = 1.0
    return m


def _banded_weight(w_kslice, mask):
    """w_kslice: (Cout, Cin, K) ; mask: (K, P, Q) -> (P*Cin, Q*Cout) band matrix."""
    b = jnp.einsum('kpq,oik->piqo', jnp.asarray(mask), w_kslice)
    P, Cin, Q, Cout = b.shape
    return b.reshape(P * Cin, Q * Cout)


def _bn_scale_bias(ssum, ssq, gamma, beta, count):
    mean = ssum / count
    var = jnp.maximum(ssq / count - mean * mean, 0.0)   # one-pass E[y^2]-E[y]^2
    scale = gamma * lax.rsqrt(var + EPS)
    return scale, beta - mean * scale


@functools.partial(jax.jit, static_argnames=("stride", "compute_dtype"))
def standard_block_forward(x_nchw, w1, g1, b1, w2, g2, b2, wp, gp, bp,
                           stride=2, compute_dtype=jnp.bfloat16):
    N, Cin, H, W = x_nchw.shape
    Cout = w1.shape[0]
    s = stride
    assert H % s == 0 and W % s == 0
    Ho, Wo = H // s, W // s
    Hp, Wp = H + 2, W + 2
    L_in, L_out = Wp * Cin, Wo * Cout

    # NCHW -> zero-padded NHWC -> (N, Hp, Wp*Cin); split rows into s phases so
    # every in-kernel row access is a contiguous slice even with stride 2.
    x = jnp.transpose(x_nchw, (0, 2, 3, 1)).astype(jnp.float32)
    xp = jnp.pad(x, ((0, 0), (1, 1), (1, 1), (0, 0)))
    xf = xp.reshape(N, Hp, L_in).astype(compute_dtype)
    phases = tuple(xf[:, p::s, :] for p in range(s))
    plan1 = tuple((kh % s, kh // s) for kh in range(3))   # kh tap -> (phase, row off)
    plan_sc = (1 % s, 1 // s)                             # 1x1 shortcut tap

    # banded (implicit-im2col) weight matrices, cast for the MXU.
    m1 = _band_mask(3, Wp, Wo, s, base=0)
    w1b = jnp.stack([_banded_weight(w1[:, :, kh, :], m1) for kh in range(3)],
                    axis=0).astype(compute_dtype)                    # (3, L_in, L_out)
    mp = _band_mask(1, Wp, Wo, s, base=1)
    wpb = _banded_weight(wp[:, :, 0, :], mp).astype(compute_dtype)   # (L_in, L_out)
    m2 = _band_mask(3, Wo, Wo, 1, base=-1)
    w2b = jnp.stack([_banded_weight(w2[:, :, kh, :], m2) for kh in range(3)],
                    axis=0).astype(compute_dtype)                    # (3, L_out, L_out)

    cp = pltpu.CompilerParams(dimension_semantics=("parallel",),
                              vmem_limit_bytes=32 * 1024 * 1024)

    # ---------------- pass 1: conv1 + projection conv + BN partials -------------
    kernel1 = _make_conv1_proj_kernel(plan1, plan_sc, s, Ho)
    ph_specs = [pl.BlockSpec((None,) + p.shape[1:], lambda n: (n, 0, 0))
                for p in phases]
    bytes1 = sum(int(a.size) * a.dtype.itemsize for a in (*phases, w1b, wpb)) \
        + 2 * N * Ho * L_out * 4
    y1, ysc, st1 = pl.pallas_call(
        kernel1,
        grid=(N,),
        in_specs=ph_specs + [
            pl.BlockSpec(w1b.shape, lambda n: (0, 0, 0)),
            pl.BlockSpec(wpb.shape, lambda n: (0, 0)),
        ],
        out_specs=(pl.BlockSpec((None, Ho, L_out), lambda n: (n, 0, 0)),
                   pl.BlockSpec((None, Ho, L_out), lambda n: (n, 0, 0)),
                   pl.BlockSpec((None, 4, L_out), lambda n: (n, 0, 0))),
        out_shape=(jax.ShapeDtypeStruct((N, Ho, L_out), jnp.float32),
                   jax.ShapeDtypeStruct((N, Ho, L_out), jnp.float32),
                   jax.ShapeDtypeStruct((N, 4, L_out), jnp.float32)),
        compiler_params=cp,
        cost_estimate=pl.CostEstimate(flops=int(N * 4 * 2 * Ho * L_in * L_out),
                                      transcendentals=0,
                                      bytes_accessed=int(bytes1)),
    )(*phases, w1b, wpb)

    # finalize training-mode BN1 / BN-proj scale & bias (tiny per-channel vectors)
    count = N * Ho * Wo
    stt = st1.sum(axis=0)                                     # (4, L_out)
    _fold = lambda r: r.reshape(Wo, Cout).sum(axis=0)         # -> per-channel
    scale1, bias1 = _bn_scale_bias(_fold(stt[0]), _fold(stt[1]), g1, b1, count)
    scalep, biasp = _bn_scale_bias(_fold(stt[2]), _fold(stt[3]), gp, bp, count)
    sb1 = jnp.stack([jnp.tile(scale1, Wo), jnp.tile(bias1, Wo)], 0)   # (2, L_out)
    sbp = jnp.stack([jnp.tile(scalep, Wo), jnp.tile(biasp, Wo)], 0)

    # ---------------- pass 2: bn1 + ReLU + conv2 + BN2 partials -----------------
    kernel2 = _make_bn_relu_conv2_kernel(Ho, compute_dtype)
    bytes2 = 2 * N * Ho * L_out * 4 + int(w2b.size) * w2b.dtype.itemsize
    y2, st2 = pl.pallas_call(
        kernel2,
        grid=(N,),
        in_specs=[pl.BlockSpec((None, Ho, L_out), lambda n: (n, 0, 0)),
                  pl.BlockSpec((2, L_out), lambda n: (0, 0)),
                  pl.BlockSpec(w2b.shape, lambda n: (0, 0, 0))],
        out_specs=(pl.BlockSpec((None, Ho, L_out), lambda n: (n, 0, 0)),
                   pl.BlockSpec((None, 2, L_out), lambda n: (n, 0, 0))),
        out_shape=(jax.ShapeDtypeStruct((N, Ho, L_out), jnp.float32),
                   jax.ShapeDtypeStruct((N, 2, L_out), jnp.float32)),
        compiler_params=cp,
        cost_estimate=pl.CostEstimate(flops=int(N * 3 * 2 * Ho * L_out * L_out),
                                      transcendentals=0,
                                      bytes_accessed=int(bytes2)),
    )(y1, sb1, w2b)

    stt2 = st2.sum(axis=0)
    scale2, bias2 = _bn_scale_bias(_fold(stt2[0]), _fold(stt2[1]), g2, b2, count)
    sb2 = jnp.stack([jnp.tile(scale2, Wo), jnp.tile(bias2, Wo)], 0)

    # ---------------- pass 3: bn2 + bn_proj + residual add + ReLU ---------------
    out = pl.pallas_call(
        _bn_add_relu_kernel,
        grid=(N,),
        in_specs=[pl.BlockSpec((None, Ho, L_out), lambda n: (n, 0, 0)),
                  pl.BlockSpec((None, Ho, L_out), lambda n: (n, 0, 0)),
                  pl.BlockSpec((2, L_out), lambda n: (0, 0)),
                  pl.BlockSpec((2, L_out), lambda n: (0, 0))],
        out_specs=pl.BlockSpec((None, Ho, L_out), lambda n: (n, 0, 0)),
        out_shape=jax.ShapeDtypeStruct((N, Ho, L_out), jnp.float32),
        compiler_params=cp,
    )(y2, ysc, sb2, sbp)

    return jnp.transpose(out.reshape(N, Ho, Wo, Cout), (0, 3, 1, 2))   # NCHW


# ------------------------------ pure-JAX reference ------------------------------
def ref_forward(x, w1, g1, b1, w2, g2, b2, wp, gp, bp, stride):
    def conv(x, w, s, pad):
        return lax.conv_general_dilated(
            x, w, (s, s), [(pad, pad), (pad, pad)],
            dimension_numbers=("NCHW", "OIHW", "NCHW"))

    def bn(x, g, b):
        mean = jnp.mean(x, axis=(0, 2, 3), keepdims=True)
        var = jnp.mean((x - mean) ** 2, axis=(0, 2, 3), keepdims=True)
        return (x - mean) * lax.rsqrt(var + EPS) * g.reshape(1, -1, 1, 1) \
            + b.reshape(1, -1, 1, 1)

    sc = bn(conv(x, wp, stride, 0), gp, bp)
    out = jnp.maximum(bn(conv(x, w1, stride, 1), g1, b1), 0.0)
    out = bn(conv(out, w2, 1, 1), g2, b2)
    return jnp.maximum(out + sc, 0.0)


# -------------------------------------- main ------------------------------------
if __name__ == "__main__":
    # standard_block(filters=8, projection_shortcut=<1x1 conv>, strides=2,
    #                first_num_filters=4)
    N, Cin, H, W = 2, 4, 16, 16
    Cout, stride = 8, 2

    ks = jax.random.split(jax.random.PRNGKey(0), 10)
    x  = jax.random.normal(ks[0], (N, Cin, H, W), jnp.float32)
    w1 = jax.random.normal(ks[1], (Cout, Cin, 3, 3), jnp.float32) * 0.1
    w2 = jax.random.normal(ks[2], (Cout, Cout, 3, 3), jnp.float32) * 0.1
    wp = jax.random.normal(ks[3], (Cout, Cin, 1, 1), jnp.float32) * 0.1
    g1 = 1.0 + 0.1 * jax.random.normal(ks[4], (Cout,), jnp.float32)
    b1 = 0.1 * jax.random.normal(ks[5], (Cout,), jnp.float32)
    g2 = 1.0 + 0.1 * jax.random.normal(ks[6], (Cout,), jnp.float32)
    b2 = 0.1 * jax.random.normal(ks[7], (Cout,), jnp.float32)
    gp = 1.0 + 0.1 * jax.random.normal(ks[8], (Cout,), jnp.float32)
    bp = 0.1 * jax.random.normal(ks[9], (Cout,), jnp.float32)

    args = (x, w1, g1, b1, w2, g2, b2, wp, gp, bp)
    ref = ref_forward(*args, stride)

    # (a) algorithmic-correctness check with f32 MXU inputs: tight tolerance.
    out_f32 = jax.block_until_ready(
        standard_block_forward(*args, stride=stride, compute_dtype=jnp.float32))
    assert out_f32.shape == (N, Cout, H // stride, W // stride)
    np.testing.assert_allclose(np.asarray(out_f32), np.asarray(ref),
                               rtol=5e-3, atol=5e-3)

    # (b) performance path: bf16 MXU inputs + f32 accumulation.  Tolerance is
    #     looser because two chained convs + batch-norm normalization amplify
    #     the bf16 input rounding; structure is identical to the f32 path above.
    out = jax.block_until_ready(
        standard_block_forward(*args, stride=stride, compute_dtype=jnp.bfloat16))
    assert out.shape == (N, Cout, H // stride, W // stride)
    np.testing.assert_allclose(np.asarray(out), np.asarray(ref),
                               rtol=1e-1, atol=1e-1)

    print("KERNEL_OK")
</pallas_src>

<mosaic_0001>
module attributes {stable_mosaic.version = 11 : i64} {
  func.func @kernel(%arg0: i32, %arg1: memref<1x9x72xf32, #tpu.memory_space<vmem>>, %arg2: memref<1x9x72xf32, #tpu.memory_space<vmem>>, %arg3: memref<3x72x64xf32, #tpu.memory_space<vmem>>, %arg4: memref<72x64xf32, #tpu.memory_space<vmem>>, %arg5: memref<1x8x64xf32, #tpu.memory_space<vmem>>, %arg6: memref<1x8x64xf32, #tpu.memory_space<vmem>>, %arg7: memref<1x4x64xf32, #tpu.memory_space<vmem>>) attributes {dimension_semantics = [#tpu.dimension_semantics<parallel>], iteration_bounds = array<i64: 2>, scalar_prefetch = 0 : i64, scratch_operands = 0 : i64, tpu.core_type = #tpu.core_type<tc>, window_params = [{transform_indices = @transform_0, window_bounds = array<i64: 1, 9, 72>}, {transform_indices = @transform_1, window_bounds = array<i64: 1, 9, 72>}, {pipeline_mode = #tpu.pipeline_mode<synchronous>, transform_indices = @transform_2, window_bounds = array<i64: 3, 72, 64>}, {pipeline_mode = #tpu.pipeline_mode<synchronous>, transform_indices = @transform_3, window_bounds = array<i64: 72, 64>}, {transform_indices = @transform_4, window_bounds = array<i64: 1, 8, 64>}, {transform_indices = @transform_5, window_bounds = array<i64: 1, 8, 64>}, {transform_indices = @transform_6, window_bounds = array<i64: 1, 4, 64>}]} {
    %c0 = arith.constant 0 : index
    %c0_0 = arith.constant 0 : index
    %c0_1 = arith.constant 0 : index
    %0 = vector.load %arg1[%c0, %c0_0, %c0_1] : memref<1x9x72xf32, #tpu.memory_space<vmem>>, vector<1x8x72xf32>
    %1 = vector.shape_cast %0 : vector<1x8x72xf32> to vector<8x72xf32>
    %c0_2 = arith.constant 0 : index
    %c0_3 = arith.constant 0 : index
    %c0_4 = arith.constant 0 : index
    %2 = vector.load %arg3[%c0_2, %c0_3, %c0_4] : memref<3x72x64xf32, #tpu.memory_space<vmem>>, vector<1x72x64xf32>
    %3 = vector.shape_cast %2 : vector<1x72x64xf32> to vector<72x64xf32>
    %cst = arith.constant dense<0.000000e+00> : vector<8x64xf32>
    %4 = tpu.matmul %1, %3, %cst {dimension_numbers = #tpu.dot_dimension_numbers<[1], [0], [0], [1], [0, 0, 1, 1], [], []>} : vector<8x72xf32>, vector<72x64xf32>, vector<8x64xf32> -> vector<8x64xf32>
    %c0_5 = arith.constant 0 : index
    %c0_6 = arith.constant 0 : index
    %c0_7 = arith.constant 0 : index
    %5 = vector.load %arg2[%c0_5, %c0_6, %c0_7] : memref<1x9x72xf32, #tpu.memory_space<vmem>>, vector<1x8x72xf32>
    %6 = vector.shape_cast %5 : vector<1x8x72xf32> to vector<8x72xf32>
    %c1 = arith.constant 1 : index
    %c0_8 = arith.constant 0 : index
    %c0_9 = arith.constant 0 : index
    %7 = vector.load %arg3[%c1, %c0_8, %c0_9] : memref<3x72x64xf32, #tpu.memory_space<vmem>>, vector<1x72x64xf32>
    %8 = vector.shape_cast %7 : vector<1x72x64xf32> to vector<72x64xf32>
    %cst_10 = arith.constant dense<0.000000e+00> : vector<8x64xf32>
    %9 = tpu.matmul %6, %8, %cst_10 {dimension_numbers = #tpu.dot_dimension_numbers<[1], [0], [0], [1], [0, 0, 1, 1], [], []>} : vector<8x72xf32>, vector<72x64xf32>, vector<8x64xf32> -> vector<8x64xf32>
    %10 = arith.addf %4, %9 : vector<8x64xf32>
    %c0_11 = arith.constant 0 : index
    %c1_12 = arith.constant 1 : index
    %c0_13 = arith.constant 0 : index
    %11 = vector.load %arg1[%c0_11, %c1_12, %c0_13] : memref<1x9x72xf32, #tpu.memory_space<vmem>>, vector<1x8x72xf32>
    %12 = vector.shape_cast %11 : vector<1x8x72xf32> to vector<8x72xf32>
    %c2 = arith.constant 2 : index
    %c0_14 = arith.constant 0 : index
    %c0_15 = arith.constant 0 : index
    %13 = vector.load %arg3[%c2, %c0_14, %c0_15] : memref<3x72x64xf32, #tpu.memory_space<vmem>>, vector<1x72x64xf32>
    %14 = vector.shape_cast %13 : vector<1x72x64xf32> to vector<72x64xf32>
    %cst_16 = arith.constant dense<0.000000e+00> : vector<8x64xf32>
    %15 = tpu.matmul %12, %14, %cst_16 {dimension_numbers = #tpu.dot_dimension_numbers<[1], [0], [0], [1], [0, 0, 1, 1], [], []>} : vector<8x72xf32>, vector<72x64xf32>, vector<8x64xf32> -> vector<8x64xf32>
    %16 = arith.addf %10, %15 : vector<8x64xf32>
    %c0_17 = arith.constant 0 : index
    %c0_18 = arith.constant 0 : index
    %c0_19 = arith.constant 0 : index
    %17 = vector.load %arg2[%c0_17, %c0_18, %c0_19] : memref<1x9x72xf32, #tpu.memory_space<vmem>>, vector<1x8x72xf32>
    %18 = vector.shape_cast %17 : vector<1x8x72xf32> to vector<8x72xf32>
    %c0_20 = arith.constant 0 : index
    %c0_21 = arith.constant 0 : index
    %19 = vector.load %arg4[%c0_20, %c0_21] : memref<72x64xf32, #tpu.memory_space<vmem>>, vector<72x64xf32>
    %cst_22 = arith.constant dense<0.000000e+00> : vector<8x64xf32>
    %20 = tpu.matmul %18, %19, %cst_22 {dimension_numbers = #tpu.dot_dimension_numbers<[1], [0], [0], [1], [0, 0, 1, 1], [], []>} : vector<8x72xf32>, vector<72x64xf32>, vector<8x64xf32> -> vector<8x64xf32>
    %c0_23 = arith.constant 0 : index
    %c0_24 = arith.constant 0 : index
    %c0_25 = arith.constant 0 : index
    %21 = vector.load %arg5[%c0_23, %c0_24, %c0_25] : memref<1x8x64xf32, #tpu.memory_space<vmem>>, vector<1x8x64xf32>
    %22 = vector.shape_cast %21 : vector<1x8x64xf32> to vector<8x64xf32>
    %23 = vector.shape_cast %16 : vector<8x64xf32> to vector<1x8x64xf32>
    tpu.vector_store %arg5[%c0_23, %c0_24, %c0_25], %23 {strides = array<i32>} : memref<1x8x64xf32, #tpu.memory_space<vmem>>, vector<1x8x64xf32>,
    %c0_26 = arith.constant 0 : index
    %c0_27 = arith.constant 0 : index
    %c0_28 = arith.constant 0 : index
    %24 = vector.load %arg6[%c0_26, %c0_27, %c0_28] : memref<1x8x64xf32, #tpu.memory_space<vmem>>, vector<1x8x64xf32>
    %25 = vector.shape_cast %24 : vector<1x8x64xf32> to vector<8x64xf32>
    %26 = vector.shape_cast %20 : vector<8x64xf32> to vector<1x8x64xf32>
    tpu.vector_store %arg6[%c0_26, %c0_27, %c0_28], %26 {strides = array<i32>} : memref<1x8x64xf32, #tpu.memory_space<vmem>>, vector<1x8x64xf32>,
    %cst_29 = arith.constant dense<0.000000e+00> : vector<64xf32>
    %27 = vector.multi_reduction <add>, %16, %cst_29 [0] : vector<8x64xf32> to vector<64xf32>
    %28 = vector.shape_cast %27 : vector<64xf32> to vector<1x64xf32>
    %29 = arith.mulf %16, %16 : vector<8x64xf32>
    %cst_30 = arith.constant dense<0.000000e+00> : vector<64xf32>
    %30 = vector.multi_reduction <add>, %29, %cst_30 [0] : vector<8x64xf32> to vector<64xf32>
    %31 = vector.shape_cast %30 : vector<64xf32> to vector<1x64xf32>
    %cst_31 = arith.constant dense<0.000000e+00> : vector<64xf32>
    %32 = vector.multi_reduction <add>, %20, %cst_31 [0] : vector<8x64xf32> to vector<64xf32>
    %33 = vector.shape_cast %32 : vector<64xf32> to vector<1x64xf32>
    %34 = arith.mulf %20, %20 : vector<8x64xf32>
    %cst_32 = arith.constant dense<0.000000e+00> : vector<64xf32>
    %35 = vector.multi_reduction <add>, %34, %cst_32 [0] : vector<8x64xf32> to vector<64xf32>
    %36 = vector.shape_cast %35 : vector<64xf32> to vector<1x64xf32>
    %37 = tpu.concatenate %28, %31, %33, %36 in 0 : vector<1x64xf32>, vector<1x64xf32>, vector<1x64xf32>, vector<1x64xf32> -> vector<4x64xf32>
    %c0_33 = arith.constant 0 : index
    %c0_34 = arith.constant 0 : index
    %c0_35 = arith.constant 0 : index
    %38 = vector.load %arg7[%c0_33, %c0_34, %c0_35] : memref<1x4x64xf32, #tpu.memory_space<vmem>>, vector<1x4x64xf32>
    %39 = vector.shape_cast %38 : vector<1x4x64xf32> to vector<4x64xf32>
    %40 = vector.shape_cast %37 : vector<4x64xf32> to vector<1x4x64xf32>
    tpu.vector_store %arg7[%c0_33, %c0_34, %c0_35], %40 {strides = array<i32>} : memref<1x4x64xf32, #tpu.memory_space<vmem>>, vector<1x4x64xf32>,
    return
  }
  func.func @transform_0(%arg0: i32) -> (i32, i32, i32) {
    %c0_i32 = arith.constant 0 : i32
    %c0_i32_0 = arith.constant 0 : i32
    %c0_i32_1 = arith.constant 0 : i32
    return %arg0, %c0_i32, %c0_i32_0 : i32, i32, i32
  }
  func.func @transform_1(%arg0: i32) -> (i32, i32, i32) {
    %c0_i32 = arith.constant 0 : i32
    %c0_i32_0 = arith.constant 0 : i32
    %c0_i32_1 = arith.constant 0 : i32
    return %arg0, %c0_i32, %c0_i32_0 : i32, i32, i32
  }
  func.func @transform_2(%arg0: i32) -> (i32, i32, i32) {
    %c0_i32 = arith.constant 0 : i32
    %c0_i32_0 = arith.constant 0 : i32
    %c0_i32_1 = arith.constant 0 : i32
    %c0_i32_2 = arith.constant 0 : i32
    return %c0_i32, %c0_i32_0, %c0_i32_1 : i32, i32, i32
  }
  func.func @transform_3(%arg0: i32) -> (i32, i32) {
    %c0_i32 = arith.constant 0 : i32
    %c0_i32_0 = arith.constant 0 : i32
    %c0_i32_1 = arith.constant 0 : i32
    return %c0_i32, %c0_i32_0 : i32, i32
  }
  func.func @transform_4(%arg0: i32) -> (i32, i32, i32) {
    %c0_i32 = arith.constant 0 : i32
    %c0_i32_0 = arith.constant 0 : i32
    %c0_i32_1 = arith.constant 0 : i32
    return %arg0, %c0_i32, %c0_i32_0 : i32, i32, i32
  }
  func.func @transform_5(%arg0: i32) -> (i32, i32, i32) {
    %c0_i32 = arith.constant 0 : i32
    %c0_i32_0 = arith.constant 0 : i32
    %c0_i32_1 = arith.constant 0 : i32
    return %arg0, %c0_i32, %c0_i32_0 : i32, i32, i32
  }
  func.func @transform_6(%arg0: i32) -> (i32, i32, i32) {
    %c0_i32 = arith.constant 0 : i32
    %c0_i32_0 = arith.constant 0 : i32
    %c0_i32_1 = arith.constant 0 : i32
    return %arg0, %c0_i32, %c0_i32_0 : i32, i32, i32
  }
}

module attributes {stable_mosaic.version = 11 : i64} {
  func.func @kernel(%arg0: i32, %arg1: memref<1x8x64xf32, #tpu.memory_space<vmem>>, %arg2: memref<2x64xf32, #tpu.memory_space<vmem>>, %arg3: memref<3x64x64xf32, #tpu.memory_space<vmem>>, %arg4: memref<1x8x64xf32, #tpu.memory_space<vmem>>, %arg5: memref<1x2x64xf32, #tpu.memory_space<vmem>>) attributes {dimension_semantics = [#tpu.dimension_semantics<parallel>], iteration_bounds = array<i64: 2>, scalar_prefetch = 0 : i64, scratch_operands = 0 : i64, tpu.core_type = #tpu.core_type<tc>, window_params = [{transform_indices = @transform_0, window_bounds = array<i64: 1, 8, 64>}, {pipeline_mode = #tpu.pipeline_mode<synchronous>, transform_indices = @transform_1, window_bounds = array<i64: 2, 64>}, {pipeline_mode = #tpu.pipeline_mode<synchronous>, transform_indices = @transform_2, window_bounds = array<i64: 3, 64, 64>}, {transform_indices = @transform_3, window_bounds = array<i64: 1, 8, 64>}, {transform_indices = @transform_4, window_bounds = array<i64: 1, 2, 64>}]} {
    %c0 = arith.constant 0 : index
    %c0_0 = arith.constant 0 : index
    %0 = vector.load %arg2[%c0, %c0_0] : memref<2x64xf32, #tpu.memory_space<vmem>>, vector<2x64xf32>
    %c0_1 = arith.constant 0 : index
    %c0_2 = arith.constant 0 : index
    %c0_3 = arith.constant 0 : index
    %1 = vector.load %arg1[%c0_1, %c0_2, %c0_3] : memref<1x8x64xf32, #tpu.memory_space<vmem>>, vector<1x8x64xf32>
    %2 = vector.shape_cast %1 : vector<1x8x64xf32> to vector<8x64xf32>
    %3 = vector.extract_strided_slice %0 {offsets = [0, 0], sizes = [1, 64], strides = [1, 1]} : vector<2x64xf32> to vector<1x64xf32>
    %4 = vector.broadcast %3 : vector<1x64xf32> to vector<8x64xf32>
    %5 = arith.mulf %2, %4 : vector<8x64xf32>
    %6 = vector.extract_strided_slice %0 {offsets = [1, 0], sizes = [1, 64], strides = [1, 1]} : vector<2x64xf32> to vector<1x64xf32>
    %7 = vector.broadcast %6 : vector<1x64xf32> to vector<8x64xf32>
    %8 = arith.addf %5, %7 : vector<8x64xf32>
    %cst = arith.constant 0.000000e+00 : f32
    %9 = vector.broadcast %cst : f32 to vector<8x64xf32>
    %10 = arith.maximumf %8, %9 : vector<8x64xf32>
    %cst_4 = arith.constant 0.000000e+00 : f32
    %11 = vector.broadcast %cst_4 : f32 to vector<1x64xf32>
    %12 = tpu.concatenate %11, %10, %11 in 0 : vector<1x64xf32>, vector<8x64xf32>, vector<1x64xf32> -> vector<10x64xf32>
    %13 = vector.extract_strided_slice %12 {offsets = [0, 0], sizes = [8, 64], strides = [1, 1]} : vector<10x64xf32> to vector<8x64xf32>
    %c0_5 = arith.constant 0 : index
    %c0_6 = arith.constant 0 : index
    %c0_7 = arith.constant 0 : index
    %14 = vector.load %arg3[%c0_5, %c0_6, %c0_7] : memref<3x64x64xf32, #tpu.memory_space<vmem>>, vector<1x64x64xf32>
    %15 = vector.shape_cast %14 : vector<1x64x64xf32> to vector<64x64xf32>
    %cst_8 = arith.constant dense<0.000000e+00> : vector<8x64xf32>
    %16 = tpu.matmul %13, %15, %cst_8 {dimension_numbers = #tpu.dot_dimension_numbers<[1], [0], [0], [1], [0, 0, 1, 1], [], []>} : vector<8x64xf32>, vector<64x64xf32>, vector<8x64xf32> -> vector<8x64xf32>
    %17 = vector.extract_strided_slice %12 {offsets = [1, 0], sizes = [8, 64], strides = [1, 1]} : vector<10x64xf32> to vector<8x64xf32>
    %c1 = arith.constant 1 : index
    %c0_9 = arith.constant 0 : index
    %c0_10 = arith.constant 0 : index
    %18 = vector.load %arg3[%c1, %c0_9, %c0_10] : memref<3x64x64xf32, #tpu.memory_space<vmem>>, vector<1x64x64xf32>
    %19 = vector.shape_cast %18 : vector<1x64x64xf32> to vector<64x64xf32>
    %cst_11 = arith.constant dense<0.000000e+00> : vector<8x64xf32>
    %20 = tpu.matmul %17, %19, %cst_11 {dimension_numbers = #tpu.dot_dimension_numbers<[1], [0], [0], [1], [0, 0, 1, 1], [], []>} : vector<8x64xf32>, vector<64x64xf32>, vector<8x64xf32> -> vector<8x64xf32>
    %21 = arith.addf %16, %20 : vector<8x64xf32>
    %22 = vector.extract_strided_slice %12 {offsets = [2, 0], sizes = [8, 64], strides = [1, 1]} : vector<10x64xf32> to vector<8x64xf32>
    %c2 = arith.constant 2 : index
    %c0_12 = arith.constant 0 : index
    %c0_13 = arith.constant 0 : index
    %23 = vector.load %arg3[%c2, %c0_12, %c0_13] : memref<3x64x64xf32, #tpu.memory_space<vmem>>, vector<1x64x64xf32>
    %24 = vector.shape_cast %23 : vector<1x64x64xf32> to vector<64x64xf32>
    %cst_14 = arith.constant dense<0.000000e+00> : vector<8x64xf32>
    %25 = tpu.matmul %22, %24, %cst_14 {dimension_numbers = #tpu.dot_dimension_numbers<[1], [0], [0], [1], [0, 0, 1, 1], [], []>} : vector<8x64xf32>, vector<64x64xf32>, vector<8x64xf32> -> vector<8x64xf32>
    %26 = arith.addf %21, %25 : vector<8x64xf32>
    %c0_15 = arith.constant 0 : index
    %c0_16 = arith.constant 0 : index
    %c0_17 = arith.constant 0 : index
    %27 = vector.load %arg4[%c0_15, %c0_16, %c0_17] : memref<1x8x64xf32, #tpu.memory_space<vmem>>, vector<1x8x64xf32>
    %28 = vector.shape_cast %27 : vector<1x8x64xf32> to vector<8x64xf32>
    %29 = vector.shape_cast %26 : vector<8x64xf32> to vector<1x8x64xf32>
    tpu.vector_store %arg4[%c0_15, %c0_16, %c0_17], %29 {strides = array<i32>} : memref<1x8x64xf32, #tpu.memory_space<vmem>>, vector<1x8x64xf32>,
    %cst_18 = arith.constant dense<0.000000e+00> : vector<64xf32>
    %30 = vector.multi_reduction <add>, %26, %cst_18 [0] : vector<8x64xf32> to vector<64xf32>
    %31 = vector.shape_cast %30 : vector<64xf32> to vector<1x64xf32>
    %32 = arith.mulf %26, %26 : vector<8x64xf32>
    %cst_19 = arith.constant dense<0.000000e+00> : vector<64xf32>
    %33 = vector.multi_reduction <add>, %32, %cst_19 [0] : vector<8x64xf32> to vector<64xf32>
    %34 = vector.shape_cast %33 : vector<64xf32> to vector<1x64xf32>
    %35 = tpu.concatenate %31, %34 in 0 : vector<1x64xf32>, vector<1x64xf32> -> vector<2x64xf32>
    %c0_20 = arith.constant 0 : index
    %c0_21 = arith.constant 0 : index
    %c0_22 = arith.constant 0 : index
    %36 = vector.load %arg5[%c0_20, %c0_21, %c0_22] : memref<1x2x64xf32, #tpu.memory_space<vmem>>, vector<1x2x64xf32>
    %37 = vector.shape_cast %36 : vector<1x2x64xf32> to vector<2x64xf32>
    %38 = vector.shape_cast %35 : vector<2x64xf32> to vector<1x2x64xf32>
    tpu.vector_store %arg5[%c0_20, %c0_21, %c0_22], %38 {strides = array<i32>} : memref<1x2x64xf32, #tpu.memory_space<vmem>>, vector<1x2x64xf32>,
    return
  }
  func.func @transform_0(%arg0: i32) -> (i32, i32, i32) {
    %c0_i32 = arith.constant 0 : i32
    %c0_i32_0 = arith.constant 0 : i32
    %c0_i32_1 = arith.constant 0 : i32
    return %arg0, %c0_i32, %c0_i32_0 : i32, i32, i32
  }
  func.func @transform_1(%arg0: i32) -> (i32, i32) {
    %c0_i32 = arith.constant 0 : i32
    %c0_i32_0 = arith.constant 0 : i32
    %c0_i32_1 = arith.constant 0 : i32
    return %c0_i32, %c0_i32_0 : i32, i32
  }
  func.func @transform_2(%arg0: i32) -> (i32, i32, i32) {
    %c0_i32 = arith.constant 0 : i32
    %c0_i32_0 = arith.constant 0 : i32
    %c0_i32_1 = arith.constant 0 : i32
    %c0_i32_2 = arith.constant 0 : i32
    return %c0_i32, %c0_i32_0, %c0_i32_1 : i32, i32, i32
  }
  func.func @transform_3(%arg0: i32) -> (i32, i32, i32) {
    %c0_i32 = arith.constant 0 : i32
    %c0_i32_0 = arith.constant 0 : i32
    %c0_i32_1 = arith.constant 0 : i32
    return %arg0, %c0_i32, %c0_i32_0 : i32, i32, i32
  }
  func.func @transform_4(%arg0: i32) -> (i32, i32, i32) {
    %c0_i32 = arith.constant 0 : i32
    %c0_i32_0 = arith.constant 0 : i32
    %c0_i32_1 = arith.constant 0 : i32
    return %arg0, %c0_i32, %c0_i32_0 : i32, i32, i32
  }
}

module attributes {stable_mosaic.version = 11 : i64} {
  func.func @_bn_add_relu_kernel(%arg0: i32, %arg1: memref<1x8x64xf32, #tpu.memory_space<vmem>>, %arg2: memref<1x8x64xf32, #tpu.memory_space<vmem>>, %arg3: memref<2x64xf32, #tpu.memory_space<vmem>>, %arg4: memref<2x64xf32, #tpu.memory_space<vmem>>, %arg5: memref<1x8x64xf32, #tpu.memory_space<vmem>>) attributes {dimension_semantics = [#tpu.dimension_semantics<parallel>], iteration_bounds = array<i64: 2>, scalar_prefetch = 0 : i64, scratch_operands = 0 : i64, tpu.core_type = #tpu.core_type<tc>, window_params = [{transform_indices = @transform_0, window_bounds = array<i64: 1, 8, 64>}, {transform_indices = @transform_1, window_bounds = array<i64: 1, 8, 64>}, {pipeline_mode = #tpu.pipeline_mode<synchronous>, transform_indices = @transform_2, window_bounds = array<i64: 2, 64>}, {pipeline_mode = #tpu.pipeline_mode<synchronous>, transform_indices = @transform_3, window_bounds = array<i64: 2, 64>}, {transform_indices = @transform_4, window_bounds = array<i64: 1, 8, 64>}]} {
    %c0 = arith.constant 0 : index
    %c0_0 = arith.constant 0 : index
    %0 = vector.load %arg3[%c0, %c0_0] : memref<2x64xf32, #tpu.memory_space<vmem>>, vector<2x64xf32>
    %c0_1 = arith.constant 0 : index
    %c0_2 = arith.constant 0 : index
    %1 = vector.load %arg4[%c0_1, %c0_2] : memref<2x64xf32, #tpu.memory_space<vmem>>, vector<2x64xf32>
    %c0_3 = arith.constant 0 : index
    %c0_4 = arith.constant 0 : index
    %c0_5 = arith.constant 0 : index
    %2 = vector.load %arg1[%c0_3, %c0_4, %c0_5] : memref<1x8x64xf32, #tpu.memory_space<vmem>>, vector<1x8x64xf32>
    %3 = vector.shape_cast %2 : vector<1x8x64xf32> to vector<8x64xf32>
    %4 = vector.extract_strided_slice %0 {offsets = [0, 0], sizes = [1, 64], strides = [1, 1]} : vector<2x64xf32> to vector<1x64xf32>
    %5 = vector.broadcast %4 : vector<1x64xf32> to vector<8x64xf32>
    %6 = arith.mulf %3, %5 : vector<8x64xf32>
    %7 = vector.extract_strided_slice %0 {offsets = [1, 0], sizes = [1, 64], strides = [1, 1]} : vector<2x64xf32> to vector<1x64xf32>
    %8 = vector.broadcast %7 : vector<1x64xf32> to vector<8x64xf32>
    %9 = arith.addf %6, %8 : vector<8x64xf32>
    %c0_6 = arith.constant 0 : index
    %c0_7 = arith.constant 0 : index
    %c0_8 = arith.constant 0 : index
    %10 = vector.load %arg2[%c0_6, %c0_7, %c0_8] : memref<1x8x64xf32, #tpu.memory_space<vmem>>, vector<1x8x64xf32>
    %11 = vector.shape_cast %10 : vector<1x8x64xf32> to vector<8x64xf32>
    %12 = vector.extract_strided_slice %1 {offsets = [0, 0], sizes = [1, 64], strides = [1, 1]} : vector<2x64xf32> to vector<1x64xf32>
    %13 = vector.broadcast %12 : vector<1x64xf32> to vector<8x64xf32>
    %14 = arith.mulf %11, %13 : vector<8x64xf32>
    %15 = arith.addf %9, %14 : vector<8x64xf32>
    %16 = vector.extract_strided_slice %1 {offsets = [1, 0], sizes = [1, 64], strides = [1, 1]} : vector<2x64xf32> to vector<1x64xf32>
    %17 = vector.broadcast %16 : vector<1x64xf32> to vector<8x64xf32>
    %18 = arith.addf %15, %17 : vector<8x64xf32>
    %cst = arith.constant 0.000000e+00 : f32
    %19 = vector.broadcast %cst : f32 to vector<8x64xf32>
    %20 = arith.maximumf %18, %19 : vector<8x64xf32>
    %c0_9 = arith.constant 0 : index
    %c0_10 = arith.constant 0 : index
    %c0_11 = arith.constant 0 : index
    %21 = vector.load %arg5[%c0_9, %c0_10, %c0_11] : memref<1x8x64xf32, #tpu.memory_space<vmem>>, vector<1x8x64xf32>
    %22 = vector.shape_cast %21 : vector<1x8x64xf32> to vector<8x64xf32>
    %23 = vector.shape_cast %20 : vector<8x64xf32> to vector<1x8x64xf32>
    tpu.vector_store %arg5[%c0_9, %c0_10, %c0_11], %23 {strides = array<i32>} : memref<1x8x64xf32, #tpu.memory_space<vmem>>, vector<1x8x64xf32>,
    return
  }
  func.func @transform_0(%arg0: i32) -> (i32, i32, i32) {
    %c0_i32 = arith.constant 0 : i32
    %c0_i32_0 = arith.constant 0 : i32
    %c0_i32_1 = arith.constant 0 : i32
    return %arg0, %c0_i32, %c0_i32_0 : i32, i32, i32
  }
  func.func @transform_1(%arg0: i32) -> (i32, i32, i32) {
    %c0_i32 = arith.constant 0 : i32
    %c0_i32_0 = arith.constant 0 : i32
    %c0_i32_1 = arith.constant 0 : i32
    return %arg0, %c0_i32, %c0_i32_0 : i32, i32, i32
  }
  func.func @transform_2(%arg0: i32) -> (i32, i32) {
    %c0_i32 = arith.constant 0 : i32
    %c0_i32_0 = arith.constant 0 : i32
    %c0_i32_1 = arith.constant 0 : i32
    return %c0_i32, %c0_i32_0 : i32, i32
  }
  func.func @transform_3(%arg0: i32) -> (i32, i32) {
    %c0_i32 = arith.constant 0 : i32
    %c0_i32_0 = arith.constant 0 : i32
    %c0_i32_1 = arith.constant 0 : i32
    return %c0_i32, %c0_i32_0 : i32, i32
  }
  func.func @transform_4(%arg0: i32) -> (i32, i32, i32) {
    %c0_i32 = arith.constant 0 : i32
    %c0_i32_0 = arith.constant 0 : i32
    %c0_i32_1 = arith.constant 0 : i32
    return %arg0, %c0_i32, %c0_i32_0 : i32, i32, i32
  }
}

</mosaic_0001>

<bundles_post_ra>
// kernel: squeeze.20
= control target key start
LH: loop header
LB: loop body
LE: loop exit
PB: predicated region body
PF: predicated region fallthrough
CT: control target
= control target key end

     0   :  { %s66_s8 = smov 104   ;;  %vm7_vm0 = vcmask 64512   ;;  %s67_s11 = smov 112   ;;  %s117_s0 = inlined_call_operand.vmem [shape: f32[64], index: 0, kind: input, shape index: {}]   ;;  %s118_s1 = inlined_call_operand.vmem [shape: f32[8,8], index: 1, kind: output, shape index: {}]  }
   0x1   :  { %v4_v0 = vld [vmem:[%s117_s0] sm:$0x1]  ;;  %s65_s0 = smov 120   ;;  %s68_s12 = smov 96  }
   0x2   :  { %5 = vst [vmem:[#allocation0] sm:$0x1] %v4_v0  ;;  %s69_s13 = smov 88   ;;  %s70_s14 = smov 80  }
   0x3   :  { %s71_s15 = smov 72  }
   0x9   :  { %v9_v1 = vld [vmem:[#allocation0] sm:$0x1]  }
   0xa   :  { %v21_v2 = vld [vmem:[#allocation0] sm:$0x1]   ;;  %10 = vrot.lane.b32.xlu0 %v9_v1, %s65_s0 }
   0xb   :  { %22 = vrot.lane.b32.xlu1 %v21_v2, %s66_s8  ;;  %v15_v3 = vld [vmem:[#allocation0] sm:$0x1]  }
   0xc   :  { %v27_v4 = vld [vmem:[#allocation0] sm:$0x1]  }
   0xd   :  { %v6_v5 = vld [vmem:[#allocation0] sm:$0x1]  }
   0xe   :  { %8 = vst.msk [vmem:[%s118_s1] sm:$0x1] %vm7_vm0, %v6_v5   ;;  %16 = vrot.lane.b32.xlu0 %v15_v3, %s67_s11  ;;  %v33_v6 = vld [vmem:[#allocation0] sm:$0x1]  }
   0xf   :  { %28 = vrot.lane.b32.xlu1 %v27_v4, %s68_s12  ;;  %v39_v7 = vld [vmem:[#allocation0] sm:$0x1]  }
  0x10   :  { %v45_v8 = vld [vmem:[#allocation0] sm:$0x1]  }
  0x12   :  { %34 = vrot.lane.b32.xlu0 %v33_v6, %s69_s13 }
  0x13   :  { %40 = vrot.lane.b32.xlu1 %v39_v7, %s70_s14 }
  0x16   :  { %46 = vrot.lane.b32.xlu0 %v45_v8, %s71_s15 }
  0x7c   :  { %v11_v9 = vpop.permute.xlu0 %10  }
  0x7d   :  { %v23_v10 = vpop.permute.xlu1 %22   ;;  %51 = vst.msk [vmem:[%s118_s1 + $0x1] sm:$0x1] %vm7_vm0, %v11_v9  }
  0x7e   :  { %53 = vst.msk [vmem:[%s118_s1 + $0x3] sm:$0x1] %vm7_vm0, %v23_v10  }
  0x80   :  { %v17_v11 = vpop.permute.xlu0 %16  }
  0x81   :  { %v29_v12 = vpop.permute.xlu1 %28   ;;  %52 = vst.msk [vmem:[%s118_s1 + $0x2] sm:$0x1] %vm7_vm0, %v17_v11  }
  0x82   :  { %54 = vst.msk [vmem:[%s118_s1 + $0x4] sm:$0x1] %vm7_vm0, %v29_v12  }
  0x84   :  { %v35_v13 = vpop.permute.xlu0 %34  }
  0x85   :  { %v41_v14 = vpop.permute.xlu1 %40   ;;  %55 = vst.msk [vmem:[%s118_s1 + $0x5] sm:$0x1] %vm7_vm0, %v35_v13  }
  0x86   :  { %56 = vst.msk [vmem:[%s118_s1 + $0x6] sm:$0x1] %vm7_vm0, %v41_v14  }
  0x88   :  { %v47_v15 = vpop.permute.xlu0 %46  }
  0x89   :  { %57 = vst.msk [vmem:[%s118_s1 + $0x7] sm:$0x1] %vm7_vm0, %v47_v15  }

// kernel: tile.33
= control target key start
LH: loop header
LB: loop body
LE: loop exit
PB: predicated region body
PF: predicated region fallthrough
CT: control target
= control target key end

     0   :  { %s22_s0 = inlined_call_operand.vmem [shape: f32[8], index: 0, kind: input, shape index: {}]   ;;  %s23_s1 = inlined_call_operand.vmem [shape: f32[8,8], index: 1, kind: output, shape index: {}]  }
   0x1   :  { %v4_v0 = vld [vmem:[%s22_s0] ss:$0 sm:$0xff] }
   0x2   :  { %5 = vst [vmem:[%s23_s1] sm:$0xff] %v4_v0 }

// kernel: tile.38
= control target key start
LH: loop header
LB: loop body
LE: loop exit
PB: predicated region body
PF: predicated region fallthrough
CT: control target
= control target key end

     0   :  { %s67_s10 = smov 56   ;;  %s68_s11 = smov 40   ;;  %vm3_vm0 = vcmask 64512   ;;  %vm9_vm1 = vcmask 523712   ;;  %vm15_vm2 = vcmask 458112   ;;  %vm21_vm3 = vcmask 392512   ;;  %s111_s0 = inlined_call_operand.vmem [shape: f32[8,8], index: 0, kind: input, shape index: {}]   ;;  %s112_s1 = inlined_call_operand.vmem [shape: f32[1,64], index: 1, kind: output, shape index: {}]  }
   0x1   :  { %v53_v0 = vld [vmem:[%s111_s0 + $0x7] sm:$0x1]   ;;  %v55_v1 = vld [vmem:[%s111_s0 + $0x5] sm:$0x1]   ;;  %v54_v2 = vld [vmem:[%s111_s0 + $0x6] sm:$0x1]  }
   0x2   :  { %7 = vrot.lane.b32.xlu0 %v53_v0, %s67_s10  ;;  %19 = vrot.lane.b32.xlu1 %v55_v1, %s68_s11  ;;  %v56_v3 = vld [vmem:[%s111_s0 + $0x4] sm:$0x1]   ;;  %v2_v4 = vld [vmem:[%s111_s0] sm:$0x1]   ;;  %s69_s18 = smov 48   ;;  %s70_s19 = smov 32  }
   0x3   :  { %4 = vst.msk [vmem:[#allocation0] sm:$0x1] %vm3_vm0, %v2_v4   ;;  %v57_v5 = vld [vmem:[%s111_s0 + $0x3] sm:$0x1]   ;;  %v58_v6 = vld [vmem:[%s111_s0 + $0x2] sm:$0x1]  }
   0x4   :  { %s71_s24 = smov 24   ;;  %s72_s25 = smov 16   ;;  %v59_v7 = vld [vmem:[%s111_s0 + $0x1] sm:$0x1]   ;;  %vm27_vm4 = vcmask 326912   ;;  %vm33_vm5 = vcmask 261312  }
   0x5   :  { %s73_s0 = smov 8   ;;  %vm39_vm6 = vcmask 195712   ;;  %vm45_vm7 = vcmask 130112  }
   0x6   :  { %13 = vrot.lane.b32.xlu0 %v54_v2, %s69_s18  ;;  %25 = vrot.lane.b32.xlu1 %v56_v3, %s70_s19 }
   0xa   :  { %31 = vrot.lane.b32.xlu0 %v57_v5, %s71_s24  ;;  %37 = vrot.lane.b32.xlu1 %v58_v6, %s72_s25 }
   0xe   :  { %43 = vrot.lane.b32.xlu0 %v59_v7, %s73_s0 }
  0x74   :  { %v8_v8 = vpop.permute.xlu0 %7   ;;  %v20_v9 = vpop.permute.xlu1 %19  }
  0x75   :  { %10 = vst.msk [vmem:[#allocation0] sm:$0x1] %vm9_vm1, %v8_v8  }
  0x78   :  { %v14_v10 = vpop.permute.xlu0 %13   ;;  %v26_v11 = vpop.permute.xlu1 %25  }
  0x79   :  { %16 = vst.msk [vmem:[#allocation0] sm:$0x1] %vm15_vm2, %v14_v10  }
  0x7a   :  { %22 = vst.msk [vmem:[#allocation0] sm:$0x1] %vm21_vm3, %v20_v9  }
  0x7b   :  { %28 = vst.msk [vmem:[#allocation0] sm:$0x1] %vm27_vm4, %v26_v11  }
  0x7c   :  { %v32_v12 = vpop.permute.xlu0 %31   ;;  %v38_v13 = vpop.permute.xlu1 %37  }
  0x7d   :  { %34 = vst.msk [vmem:[#allocation0] sm:$0x1] %vm33_vm5, %v32_v12  }
  0x7e   :  { %40 = vst.msk [vmem:[#allocation0] sm:$0x1] %vm39_vm6, %v38_v13  }
  0x80   :  { %v44_v14 = vpop.permute.xlu0 %43  }
  0x81   :  { %46 = vst.msk [vmem:[#allocation0] sm:$0x1] %vm45_vm7, %v44_v14  }
  0x88   :  { %v50_v15 = vld [vmem:[#allocation0] sm:$0x1] }
  0x89   :  { %52 = vst [vmem:[%s112_s1] sm:$0x1] %v50_v15 }

// kernel: standard_block_forward.3
= control target key start
LH: loop header
LB: loop body
LE: loop exit
PB: predicated region body
PF: predicated region fallthrough
CT: control target
= control target key end

     0   :  { %s1061_s21 = smov 0   ;;  %s1246_s0 = inlined_call_operand.vmem [shape: f32[2,9,72], index: 0, kind: input, shape index: {}]   ;;  %s1247_s1 = inlined_call_operand.vmem [shape: f32[2,9,72], index: 1, kind: input, shape index: {}]   ;;  %s1248_s2 = inlined_call_operand.vmem [shape: f32[3,72,64], index: 2, kind: input, shape index: {}]   ;;  %s1249_s3 = inlined_call_operand.vmem [shape: f32[72,64], index: 3, kind: input, shape index: {}]   ;;  %s1250_s4 = inlined_call_operand.vmem [shape: f32[2,8,64], index: 4, kind: output, shape index: {0}]   ;;  %s1251_s5 = inlined_call_operand.vmem [shape: f32[2,8,64], index: 5, kind: output, shape index: {1}]   ;;  %s1252_s6 = inlined_call_operand.vmem [shape: f32[2,4,64], index: 6, kind: output, shape index: {2}]  }
   0x1 LB: > { %s791_s22 = sadd.s32 4294967295, %s1021_s21   ;;  %p795_p0 = scmp.ge.s32.totalorder %s1021_s21, 1  ;;  %s1021_s21 = sphi %s1061_s21, %s17_s21  }
   0x2   : > { %p227_p1 = scmp.lt.s32.totalorder %s1021_s21, 3 }
   0x4   : > { %p228_p2 = pnand %p795_p0, %p227_p1 }
   0x5   : > { %v803_v0 = vld [vmem:[%s1248_s2 + $0x48] sm:$0xff] (!%p228_p2)  ;;  %v804_v1 = vld [vmem:[%s1248_s2 + $0x50] sm:$0xff] (!%p228_p2)  ;;  %v292_v2 = vld [vmem:[%s1248_s2] sm:$0xff] (!%p228_p2)  ;;  %v1023_v3 = vmov (!%p228_p2), 0.0|0.0   ;;  %vm1024_vm0 = vmmov (!%p228_p2), 0   ;;  %v1025_v11 = vmov (!%p228_p2), 0.0  }
   0x6   : > { %231 = sbr.rel (%p228_p2) target bundleno = 278 (0x116), region = 36  ;;  %953 = vmatprep.subr.bf16.mxu1 (!%p228_p2), %v1023_v3  ;;  %965 = vmatprep.subr.bf16.mxu0 (!%p228_p2), %v1023_v3  ;;  %v954_v4 = vpack.c.bf16 (!%p228_p2), %v804_v1, %v803_v0  ;;  %v293_v5 = vld [vmem:[%s1248_s2 + $0x8] sm:$0xff] (!%p228_p2)  ;;  %v805_v6 = vld [vmem:[%s1248_s2 + $0x58] sm:$0xff] (!%p228_p2)  ;;  %v806_v7 = vld [vmem:[%s1248_s2 + $0x60] sm:$0xff] (!%p228_p2)  ;;  %p269_p3 = scmp.lt.s32.totalorder (!%p228_p2), %s791_s22, 1  ;;  %vm312_vm1 = vcmask (!%p228_p2), 588800  }
   0x7   : > { %v966_v8 = vpack.c.bf16 (!%p228_p2), %v293_v5, %v292_v2  ;;  %v294_v9 = vld [vmem:[%s1248_s2 + $0x10] sm:$0xff] (!%p228_p2)  ;;  %v295_v10 = vld [vmem:[%s1248_s2 + $0x18] sm:$0xff] (!%p228_p2)  ;;  %887 = vmatprep.mubr.msk.f32.mxu1 (!%p228_p2), %vm1024_vm0, %v1025_v11  ;;  %908 = vmatprep.mubr.msk.f32.mxu0 (!%p228_p2), %vm1024_vm0, %v1025_v11  ;;  %v957_v12 = vpack.c.bf16 (!%p228_p2), %v806_v7, %v805_v6  ;;  %v807_v14 = vld [vmem:[%s1248_s2 + $0x68] sm:$0xff] (!%p228_p2)  ;;  %vm623_vm2 = vcmask (!%p228_p2), 523264   ;;  %vm656_vm3 = vcmask (!%p228_p2), 1040384  }
   0x8   : > { %955 = vmatpush3.bf16.msra.mxu1 (!%p228_p2), %v954_v4  ;;  %v969_v13 = vpack.c.bf16 (!%p228_p2), %v295_v10, %v294_v9  ;;  %v808_v15 = vld [vmem:[%s1248_s2 + $0x70] sm:$0xff] (!%p228_p2)  ;;  %v296_v16 = vld [vmem:[%s1248_s2 + $0x20] sm:$0xff] (!%p228_p2)  ;;  %v297_v17 = vld [vmem:[%s1248_s2 + $0x28] sm:$0xff] (!%p228_p2)  ;;  %vm658_vm4 = vcmask (!%p228_p2), 1041408   ;;  %vm660_vm5 = vcmask (!%p228_p2), 1042432   ;;  %vm662_vm6 = vcmask (!%p228_p2), 519168  }
   0x9   : > { %967 = vmatpush3.bf16.msra.mxu0 (!%p228_p2), %v966_v8  ;;  %956 = vmatprep.subr.bf16.mxu1 (!%p228_p2), %v1023_v3  ;;  %v960_v18 = vpack.c.bf16 (!%p228_p2), %v808_v15, %v807_v14  ;;  %v972_v19 = vpack.c.bf16 (!%p228_p2), %v297_v17, %v296_v16  ;;  %v809_v20 = vld [vmem:[%s1248_s2 + $0x78] sm:$0xff] (!%p228_p2)  ;;  %v810_v21 = vld [vmem:[%s1248_s2 + $0x80] sm:$0xff] (!%p228_p2)  ;;  %v298_v22 = vld [vmem:[%s1248_s2 + $0x30] sm:$0xff] (!%p228_p2) }
   0xa   : > { %968 = vmatprep.subr.bf16.mxu0 (!%p228_p2), %v1023_v3  ;;  %v299_v23 = vld [vmem:[%s1248_s2 + $0x38] sm:$0xff] (!%p228_p2)  ;;  %v963_v24 = vpack.c.bf16 (!%p228_p2), %v810_v21, %v809_v20  ;;  %v544_v26 = vld [vmem:[%s1249_s3] sm:$0xff] (!%p228_p2)  ;;  %v545_v27 = vld [vmem:[%s1249_s3 + $0x8] sm:$0xff] (!%p228_p2) }
   0xb   : > { %v975_v25 = vpack.c.bf16 (!%p228_p2), %v299_v23, %v298_v22  ;;  %v811_v28 = vld [vmem:[%s1248_s2 + $0x88] sm:$0xff] (!%p228_p2)  ;;  %v814_v29 = vld [vmem:[%s1248_s2 + $0x90] sm:$0xff] (!%p228_p2)  ;;  %v815_v30 = vld [vmem:[%s1248_s2 + $0x98] sm:$0xff] (!%p228_p2)  ;;  %v990_v33 = vpack.c.bf16 (!%p228_p2), %v545_v27, %v544_v26 }
   0xc   : > { %958 = vmatpush3.bf16.msra.mxu1 (!%p228_p2), %v957_v12  ;;  %v300_v31 = vld [vmem:[%s1248_s2 + $0x40] sm:$0xff] (!%p228_p2)  ;;  %v978_v35 = vpack.c.bf16 (!%p228_p2), %v815_v30, %v814_v29  ;;  %v546_v36 = vld [vmem:[%s1249_s3 + $0x10] sm:$0xff] (!%p228_p2)  ;;  %v547_v37 = vld [vmem:[%s1249_s3 + $0x18] sm:$0xff] (!%p228_p2) }
   0xd   : > { %970 = vmatpush3.bf16.msra.mxu0 %v969_v13  ;;  %959 = vmatprep.subr.bf16.mxu1 %v1023_v3  ;;  %s1254_s22 = smov (!%p269_p3, %s791_s22), 1  ;;  %v816_v38 = vld [vmem:[%s1248_s2 + $0xa0] sm:$0xff]  ;;  %v817_v39 = vld [vmem:[%s1248_s2 + $0xa8] sm:$0xff]  ;;  %v993_v40 = vpack.c.bf16 %v547_v37, %v546_v36  ;;  %v818_v44 = vld [vmem:[%s1248_s2 + $0xb0] sm:$0xff] }
   0xe   : > { %971 = vmatprep.subr.bf16.mxu0 %v1023_v3  ;;  %s827_s9 = sshll.u32 %s1254_s22, 4  ;;  %v981_v41 = vpack.c.bf16 %v817_v39, %v816_v38  ;;  %v548_v42 = vld [vmem:[%s1249_s3 + $0x20] sm:$0xff]  ;;  %v549_v43 = vld [vmem:[%s1249_s3 + $0x28] sm:$0xff]  ;;  %v819_v45 = vld [vmem:[%s1248_s2 + $0xb8] sm:$0xff]  ;;  %s800_s13 = sshll.u32 %s1254_s22, 3 }
   0xf   : > { %s278_s12 = scalar_lea.vmem %s1247_s1, %s827_s9  ;;  %s1152_s23 = scalar_lea.vmem %s1246_s0, %s827_s9  ;;  %v996_v46 = vpack.c.bf16 %v549_v43, %v548_v42  ;;  %v984_v47 = vpack.c.bf16 %v819_v45, %v818_v44  ;;  %v550_v48 = vld [vmem:[%s1249_s3 + $0x30] sm:$0xff]  ;;  %v551_v49 = vld [vmem:[%s1249_s3 + $0x38] sm:$0xff]  ;;  %v820_v50 = vld [vmem:[%s1248_s2 + $0xc0] sm:$0xff] }
  0x10   : > { %961 = vmatpush3.bf16.msra.mxu1 %v960_v18  ;;  %v301_v32 = vld [vmem:[%s278_s12] sm:$0xff]  ;;  %v821_v51 = vld [vmem:[%s1248_s2 + $0xc8] sm:$0xff]  ;;  %v999_v52 = vpack.c.bf16 %v551_v49, %v550_v48  ;;  %v822_v55 = vld [vmem:[%s1248_s2 + $0xd0] sm:$0xff]  ;;  %s286_s16 = scalar_lea.vmem %s1251_s5, %s800_s13  ;;  %s282_s19 = scalar_lea.vmem %s1250_s4, %s800_s13 }
  0x11   : > { %973 = vmatpush3.bf16.msra.mxu0 %v972_v19  ;;  %962 = vmatprep.subr.bf16.mxu1 %v1023_v3  ;;  %v291_v34 = vld [vmem:[%s1152_s23] sm:$0xff]  ;;  %v987_v53 = vpack.c.bf16 %v821_v51, %v820_v50 }
  0x12   : > { %974 = vmatprep.subr.bf16.mxu0 %v1023_v3  ;;  %v552_v54 = vld [vmem:[%s1249_s3 + $0x40] sm:$0xff] }
  0x13   : > { %v459_v56 = vld [vmem:[%s1152_s23 + $0x1] sm:$0xff]  ;;  %s802_s23 = sshll.u32 %s1254_s22, 2 }
  0x14   : > { %964 = vmatpush3.bf16.msra.mxu1 %v963_v24  ;;  %s290_s25 = scalar_lea.vmem %s1252_s6, %s802_s23 }
  0x15   : > { %976 = vmatpush3.bf16.msra.mxu0 %v975_v25  ;;  %885 = vmatprep.subr.mxu1 %v1025_v11 }
  0x16   : > { %906 = vmatprep.subr.mxu0 %v1025_v11 }
  0x18   : > { %886 = vmatpush3.msra.mxu1 %v811_v28 }
  0x19   : > { %907 = vmatpush3.msra.mxu0 %v300_v31  ;;  %989 = vmatprep.subr.bf16.mxu1 %v1023_v3 }
  0x1a   : > { %977 = vmatprep.subr.bf16.mxu0 %v1023_v3  ;;  %888 = vmatmul.mubr.msk.f32.vlgmr.msra.gmra.mrb[0].mxu1 %vm312_vm1, %v301_v32 }
  0x1b   : > { %909 = vmatmul.mubr.msk.f32.vlgmr.msra.gmra.mrb[0].mxu0 %vm312_vm1, %v291_v34  ;;  %991 = vmatpush3.bf16.msra.mxu1 %v990_v33 }
  0x1c   : > { %979 = vmatpush3.bf16.msra.mxu0 %v978_v35  ;;  %992 = vmatprep.subr.bf16.mxu1 %v1023_v3 }
  0x1d   : > { %980 = vmatprep.subr.bf16.mxu0 %v1023_v3  ;;  %929 = vmatprep.mubr.msk.f32.mxu0 %vm1024_vm0, %v1025_v11 }
  0x1e   : > { %950 = vmatprep.mubr.msk.f32.mxu1 %vm1024_vm0, %v1025_v11 }
  0x1f   : > { %994 = vmatpush3.bf16.msra.mxu1 %v993_v40 }
  0x20   : > { %982 = vmatpush3.bf16.msra.mxu0 %v981_v41  ;;  %995 = vmatprep.subr.bf16.mxu1 %v1023_v3 }
  0x21   : > { %983 = vmatprep.subr.bf16.mxu0 %v1023_v3 }
  0x23   : > { %997 = vmatpush3.bf16.msra.mxu1 %v996_v46 }
  0x24   : > { %985 = vmatpush3.bf16.msra.mxu0 %v984_v47  ;;  %998 = vmatprep.subr.bf16.mxu1 %v1023_v3 }
  0x25   : > { %986 = vmatprep.subr.bf16.mxu0 %v1023_v3 }
  0x27   : > { %1000 = vmatpush3.bf16.msra.mxu1 %v999_v52 }
  0x28   : > { %988 = vmatpush3.bf16.msra.mxu0 %v987_v53  ;;  %948 = vmatprep.subr.mxu1 %v1025_v11 }
  0x29   : > { %927 = vmatprep.subr.mxu0 %v1025_v11 }
  0x2b   : > { %949 = vmatpush3.msra.mxu1 %v552_v54 }
  0x2c   : > { %928 = vmatpush3.msra.mxu0 %v822_v55  ;;  %951 = vmatmul.mubr.msk.f32.vlgmr.msra.gmra.mrb[2].mxu1 %vm312_vm1, %v301_v32 }
  0x2d   : > { %930 = vmatmul.mubr.msk.f32.vlgmr.msra.gmra.mrb[0].mxu0 %vm312_vm1, %v459_v56 }
  0xed   : > { %v382_v57 = vpop.f32.mrb[0].mxu1 }
  0xee   : > { %v889_v58 = vpop.f32.mrb[1].mxu1 }
  0xff   : > { %v619_v59 = vpop.f32.mrb[2].mxu1 }
 0x100   : > { %v539_v60 = vpop.f32.mrb[0].mxu0  ;;  %625 = vst.msk [vmem:[%s286_s16] sm:$0xff] %vm623_vm2, %v619_v59  ;;  %v641_v61 = vsel %vm623_vm2, %v619_v59, 0.0  ;;  %v648_v62 = vmul.f32 %v619_v59, %v619_v59  ;;  %v952_v63 = vpop.f32.mrb[3].mxu1 }
 0x101   : > { %v1001_v0 = vadd.f32 %v539_v60, %v382_v57  ;;  %v642_v1 = vrot.slane %v641_v61, 4  ;;  %v931_v2 = vpop.f32.mrb[1].mxu0 }
 0x102   : > { %v649_v3 = vsel %vm623_vm2, %v648_v62, 0.0 }
 0x103   : > { %624 = vst.msk [vmem:[%s282_s19] sm:$0xff] %vm623_vm2, %v1001_v0  ;;  %v626_v4 = vsel %vm623_vm2, %v1001_v0, 0.0  ;;  %v633_v5 = vmul.f32 %v1001_v0, %v1001_v0  ;;  %v643_v6 = vadd.f32 %v642_v1, %v641_v61  ;;  %v650_v7 = vrot.slane %v649_v3, 4 }
 0x104   : > { %v627_v8 = vrot.slane %v626_v4, 4 }
 0x105   : > { %v634_v9 = vsel %vm623_vm2, %v633_v5, 0.0  ;;  %v644_v10 = vrot.slane %v643_v6, 2  ;;  %v651_v11 = vadd.f32 %v650_v7, %v649_v3 }
 0x106   : > { %v628_v12 = vadd.f32 %v627_v8, %v626_v4  ;;  %v635_v13 = vrot.slane %v634_v9, 4 }
 0x107   : > { %v652_v14 = vrot.slane %v651_v11, 2  ;;  %v645_v17 = vadd.f32 %v644_v10, %v643_v6 }
 0x108   : > { %v629_v15 = vrot.slane %v628_v12, 2  ;;  %v636_v16 = vadd.f32 %v635_v13, %v634_v9 }
 0x109   : > { %v653_v20 = vadd.f32 %v652_v14, %v651_v11  ;;  %v646_v23 = vrot.slane %v645_v17, 1 }
 0x10a   : > { %v630_v18 = vadd.f32 %v629_v15, %v628_v12  ;;  %v637_v19 = vrot.slane %v636_v16, 2 }
 0x10b   : > { %v654_v25 = vrot.slane %v653_v20, 1  ;;  %v647_v28 = vadd.f32 %v646_v23, %v645_v17 }
 0x10c   : > { %v631_v21 = vrot.slane %v630_v18, 1  ;;  %v638_v22 = vadd.f32 %v637_v19, %v636_v16 }
 0x10d   : > { %v655_v30 = vadd.f32 %v654_v25, %v653_v20 }
 0x10e   : > { %v639_v24 = vrot.slane %v638_v22, 1  ;;  %v632_v26 = vadd.f32 %v631_v21, %v630_v18 }
 0x110   : > { %v640_v27 = vadd.f32 %v639_v24, %v638_v22 }
 0x112   : > { %v657_v29 = vsel %vm656_vm3, %v632_v26, %v640_v27 }
 0x113   : > { %v659_v31 = vsel %vm658_vm4, %v657_v29, %v647_v28 }
 0x114   : > { %v661_v32 = vsel %vm660_vm5, %v659_v31, %v655_v30 }
 0x115   : > { %663 = vst.msk [vmem:[%s290_s25] sm:$0xf] %vm662_vm6, %v661_v32 }
 0x116 PF: > { %s17_s21 = sadd.s32 1, %s1021_s21  }
 0x117   : > { %p14_p4 = scmp.ge.s32.totalorder %s17_s21, 4  }
 0x119   :  { %16 = sbr.rel (!%p14_p4) target bundleno = 1 (0x1), region = 95 }

// kernel: standard_block_forward.4
= control target key start
LH: loop header
LB: loop body
LE: loop exit
PB: predicated region body
PF: predicated region fallthrough
CT: control target
= control target key end

     0   :  { %s779_s15 = smov 0   ;;  %s909_s0 = inlined_call_operand.vmem [shape: f32[2,8,64], index: 0, kind: input, shape index: {}]   ;;  %s910_s1 = inlined_call_operand.vmem [shape: f32[2,64], index: 1, kind: input, shape index: {}]   ;;  %s911_s2 = inlined_call_operand.vmem [shape: f32[3,64,64], index: 2, kind: input, shape index: {}]   ;;  %s912_s3 = inlined_call_operand.vmem [shape: f32[2,8,64], index: 3, kind: output, shape index: {0}]   ;;  %s913_s4 = inlined_call_operand.vmem [shape: f32[2,2,64], index: 4, kind: output, shape index: {1}]  }
   0x1 LB: > { %s580_s16 = sadd.s32 4294967295, %s749_s15   ;;  %p584_p0 = scmp.ge.s32.totalorder %s749_s15, 1  ;;  %s749_s15 = sphi %s779_s15, %s15_s15  }
   0x2   : > { %p164_p1 = scmp.lt.s32.totalorder %s749_s15, 3 }
   0x4   : > { %p165_p2 = pnand %p584_p0, %p164_p1 }
   0x5   : > { %v223_v0 = vld [vmem:[%s911_s2] sm:$0xff] (!%p165_p2)  ;;  %v224_v1 = vld [vmem:[%s911_s2 + $0x8] sm:$0xff] (!%p165_p2)  ;;  %v225_v2 = vld [vmem:[%s911_s2 + $0x10] sm:$0xff] (!%p165_p2)  ;;  %v206_v3 = vlaneseq (!%p165_p2)  ;;  %v751_v4 = vmov (!%p165_p2), 0.0|0.0   ;;  %p192_p3 = scmp.lt.s32.totalorder (!%p165_p2), %s580_s16, 1  ;;  %vm752_vm0 = vmmov (!%p165_p2), 0  }
   0x6   : > { %168 = sbr.rel (%p165_p2) target bundleno = 273 (0x111), region = 32  ;;  %705 = vmatprep.subr.bf16.mxu0 (!%p165_p2), %v751_v4  ;;  %v706_v5 = vpack.c.bf16 (!%p165_p2), %v224_v1, %v223_v0  ;;  %v226_v6 = vld [vmem:[%s911_s2 + $0x18] sm:$0xff] (!%p165_p2)  ;;  %693 = vmatprep.subr.bf16.mxu1 (!%p165_p2), %v751_v4  ;;  %v588_v7 = vld [vmem:[%s911_s2 + $0x40] sm:$0xff] (!%p165_p2)  ;;  %v753_v8 = vmov (!%p165_p2), 0.0   ;;  %v589_v12 = vld [vmem:[%s911_s2 + $0x48] sm:$0xff] (!%p165_p2)  ;;  %vm220_vm1 = vcmask (!%p165_p2), 1040384  }
   0x7   : > { %671 = vmatprep.mubr.msk.f32.mxu0 (!%p165_p2), %vm752_vm0, %v753_v8  ;;  %v207_v9 = vshrl.u32 (!%p165_p2), %v206_v3, 7  ;;  %652 = vmatprep.mubr.msk.f32.mxu1 (!%p165_p2), %vm752_vm0, %v753_v8  ;;  %v709_v10 = vpack.c.bf16 (!%p165_p2), %v226_v6, %v225_v2  ;;  %v227_v11 = vld [vmem:[%s911_s2 + $0x20] sm:$0xff] (!%p165_p2)  ;;  %v228_v14 = vld [vmem:[%s911_s2 + $0x28] sm:$0xff] (!%p165_p2)  ;;  %v694_v15 = vpack.c.bf16 (!%p165_p2), %v589_v12, %v588_v7  ;;  %v590_v18 = vld [vmem:[%s911_s2 + $0x50] sm:$0xff] (!%p165_p2)  ;;  %vm246_vm2 = vcmask (!%p165_p2), 523264  }
   0x8   : > { %707 = vmatpush3.bf16.msra.mxu0 (!%p165_p2), %v706_v5  ;;  %v204_v13 = vld [vmem:[%s910_s1] sm:$0x3] (!%p165_p2)  ;;  %v591_v19 = vld [vmem:[%s911_s2 + $0x58] sm:$0xff] (!%p165_p2)  ;;  %v712_v23 = vpack.c.bf16 (!%p165_p2), %v228_v14, %v227_v11  ;;  %v593_v26 = vld [vmem:[%s911_s2 + $0x68] sm:$0xff] (!%p165_p2)  ;;  %vm242_vm3 = vcmask (!%p165_p2), 1046528   ;;  %vm400_vm4 = vcmask (!%p165_p2), 1045504  }
   0x9   : > { %708 = vmatprep.subr.bf16.mxu0 (!%p165_p2), %v751_v4  ;;  %v208_v16 = vsub.s32 (!%p165_p2), 0, %v207_v9  ;;  %v213_v17 = vsub.s32 (!%p165_p2), 1, %v207_v9  ;;  %695 = vmatpush3.bf16.msra.mxu1 (!%p165_p2), %v694_v15  ;;  %v697_v22 = vpack.c.bf16 (!%p165_p2), %v591_v19, %v590_v18  ;;  %v592_v25 = vld [vmem:[%s911_s2 + $0x60] sm:$0xff] (!%p165_p2)  ;;  %v229_v27 = vld [vmem:[%s911_s2 + $0x30] sm:$0xff] (!%p165_p2)  ;;  %v230_v28 = vld [vmem:[%s911_s2 + $0x38] sm:$0xff] (!%p165_p2)  ;;  %vm494_vm5 = vcmask (!%p165_p2), 517120  }
   0xa   : > { %696 = vmatprep.subr.bf16.mxu1 (!%p165_p2), %v751_v4  ;;  %v700_v31 = vpack.c.bf16 (!%p165_p2), %v593_v26, %v592_v25  ;;  %v715_v32 = vpack.c.bf16 (!%p165_p2), %v230_v28, %v229_v27  ;;  %v594_v33 = vld [vmem:[%s911_s2 + $0x70] sm:$0xff] (!%p165_p2)  ;;  %v595_v34 = vld [vmem:[%s911_s2 + $0x78] sm:$0xff] (!%p165_p2)  ;;  %v598_v36 = vld [vmem:[%s911_s2 + $0x80] sm:$0xff] (!%p165_p2) }
   0xb   : > { %v209_v20 = vrot.slane (!%p165_p2), %v204_v13, %v208_v16  ;;  %v214_v21 = vrot.slane (!%p165_p2), %v204_v13, %v213_v17  ;;  %v599_v37 = vld [vmem:[%s911_s2 + $0x88] sm:$0xff] (!%p165_p2)  ;;  %v703_v39 = vpack.c.bf16 (!%p165_p2), %v595_v34, %v594_v33  ;;  %v600_v43 = vld [vmem:[%s911_s2 + $0x90] sm:$0xff] (!%p165_p2)  ;;  %v601_v44 = vld [vmem:[%s911_s2 + $0x98] sm:$0xff] (!%p165_p2) }
   0xc   : > { %710 = vmatpush3.bf16.msra.mxu0 (!%p165_p2), %v709_v10  ;;  %v718_v40 = vpack.c.bf16 (!%p165_p2), %v599_v37, %v598_v36  ;;  %v721_v47 = vpack.c.bf16 (!%p165_p2), %v601_v44, %v600_v43  ;;  %v602_v49 = vld [vmem:[%s911_s2 + $0xa0] sm:$0xff] (!%p165_p2)  ;;  %v603_v50 = vld [vmem:[%s911_s2 + $0xa8] sm:$0xff] (!%p165_p2)  ;;  %v604_v52 = vld [vmem:[%s911_s2 + $0xb0] sm:$0xff] (!%p165_p2) }
   0xd   : > { %s915_s16 = smov (!%p192_p3, %s580_s16), 1  ;;  %711 = vmatprep.subr.bf16.mxu0 %v751_v4  ;;  %698 = vmatpush3.bf16.msra.mxu1 %v697_v22  ;;  %v724_v51 = vpack.c.bf16 %v603_v50, %v602_v49  ;;  %v605_v53 = vld [vmem:[%s911_s2 + $0xb8] sm:$0xff] }
   0xe   : > { %s585_s13 = sshll.u32 %s915_s16, 3  ;;  %699 = vmatprep.subr.bf16.mxu1 %v751_v4  ;;  %v727_v56 = vpack.c.bf16 %v605_v53, %v604_v52 }
   0xf   : > { %s195_s18 = scalar_lea.vmem %s909_s0, %s585_s13  ;;  %s199_s26 = scalar_lea.vmem %s912_s3, %s585_s13 }
  0x10   : > { %v205_v24 = vld [vmem:[%s195_s18] sm:$0xff]  ;;  %713 = vmatpush3.bf16.msra.mxu0 %v712_v23  ;;  %s587_s13 = sshll.u32 %s915_s16, 1 }
  0x11   : > { %v210_v29 = vmul.f32 %v209_v20, %v205_v24  ;;  %714 = vmatprep.subr.bf16.mxu0 %v751_v4  ;;  %701 = vmatpush3.bf16.msra.mxu1 %v700_v31  ;;  %s203_s29 = scalar_lea.vmem %s913_s4, %s587_s13 }
  0x12   : > { %702 = vmatprep.subr.bf16.mxu1 %v751_v4 }
  0x13   : > { %v215_v30 = vadd.f32 %v214_v21, %v210_v29 }
  0x14   : > { %716 = vmatpush3.bf16.msra.mxu0 %v715_v32 }
  0x15   : > { %v216_v35 = vmax.f32 %v215_v30, 0.0  ;;  %717 = vmatprep.subr.bf16.mxu0 %v751_v4  ;;  %704 = vmatpush3.bf16.msra.mxu1 %v703_v39 }
  0x17   : > { %v218_v38 = vrot.slane %v216_v35, 7 }
  0x19   : > { %v221_v41 = vsel %vm220_vm1, 0.0, %v218_v38  ;;  %v222_v42 = vsel %vm220_vm1, %v218_v38, 0.0 }
  0x1a   : > { %v243_v45 = vrot.slane %v221_v41, 1  ;;  %v244_v46 = vrot.slane %v222_v42, 1  ;;  %672 = vmatmul.mubr.msk.f32.vlgmr.msra.gmra.mrb[0].mxu0 %vm246_vm2, %v221_v41  ;;  %v401_v54 = vrot.slane %v221_v41, 2  ;;  %v402_v55 = vrot.slane %v222_v42, 2 }
  0x1b   : > { %719 = vmatpush3.bf16.msra.mxu0 %v718_v40  ;;  %690 = vmatprep.mubr.msk.f32.mxu0 %vm752_vm0, %v753_v8 }
  0x1c   : > { %v245_v48 = vsel %vm242_vm3, %v243_v45, %v244_v46  ;;  %720 = vmatprep.subr.bf16.mxu0 %v751_v4  ;;  %v403_v57 = vsel %vm400_vm4, %v401_v54, %v402_v55 }
  0x1d   : > { %653 = vmatmul.mubr.msk.f32.vlgmr.msra.gmra.mrb[0].mxu1 %vm246_vm2, %v245_v48 }
  0x1f   : > { %722 = vmatpush3.bf16.msra.mxu0 %v721_v47 }
  0x20   : > { %723 = vmatprep.subr.bf16.mxu0 %v751_v4 }
  0x23   : > { %725 = vmatpush3.bf16.msra.mxu0 %v724_v51 }
  0x24   : > { %726 = vmatprep.subr.bf16.mxu0 %v751_v4 }
  0x27   : > { %728 = vmatpush3.bf16.msra.mxu0 %v727_v56 }
  0x2a   : > { %691 = vmatmul.mubr.msk.f32.vlgmr.msra.gmra.mrb[0].mxu0 %vm246_vm2, %v403_v57 }
  0xf0   : > { %v315_v58 = vpop.f32.mrb[0].mxu1 }
  0xf1   : > { %v654_v59 = vpop.f32.mrb[1].mxu1 }
  0xfd   : > { %v472_v60 = vpop.f32.mrb[0].mxu0 }
  0xfe   : > { %v729_v61 = vadd.f32 %v472_v60, %v315_v58  ;;  %v692_v62 = vpop.f32.mrb[1].mxu0 }
 0x100   : > { %477 = vst.msk [vmem:[%s199_s26] sm:$0xff] %vm246_vm2, %v729_v61  ;;  %v478_v63 = vsel %vm246_vm2, %v729_v61, 0.0  ;;  %v485_v0 = vmul.f32 %v729_v61, %v729_v61 }
 0x101   : > { %v479_v1 = vrot.slane %v478_v63, 4 }
 0x102   : > { %v486_v2 = vsel %vm246_vm2, %v485_v0, 0.0 }
 0x103   : > { %v480_v3 = vadd.f32 %v479_v1, %v478_v63  ;;  %v487_v4 = vrot.slane %v486_v2, 4 }
 0x105   : > { %v481_v5 = vrot.slane %v480_v3, 2  ;;  %v488_v6 = vadd.f32 %v487_v4, %v486_v2 }
 0x107   : > { %v482_v7 = vadd.f32 %v481_v5, %v480_v3  ;;  %v489_v8 = vrot.slane %v488_v6, 2 }
 0x109   : > { %v483_v9 = vrot.slane %v482_v7, 1  ;;  %v490_v10 = vadd.f32 %v489_v8, %v488_v6 }
 0x10b   : > { %v491_v11 = vrot.slane %v490_v10, 1  ;;  %v484_v12 = vadd.f32 %v483_v9, %v482_v7 }
 0x10d   : > { %v492_v13 = vadd.f32 %v491_v11, %v490_v10 }
 0x10f   : > { %v493_v14 = vsel %vm220_vm1, %v484_v12, %v492_v13 }
 0x110   : > { %495 = vst.msk [vmem:[%s203_s29] sm:$0x3] %vm494_vm5, %v493_v14 }
 0x111 PF: > { %s15_s15 = sadd.s32 1, %s749_s15  }
 0x112   : > { %p12_p4 = scmp.ge.s32.totalorder %s15_s15, 4  }
 0x114   :  { %14 = sbr.rel (!%p12_p4) target bundleno = 1 (0x1), region = 76 }

// kernel: standard_block_forward.5
= control target key start
LH: loop header
LB: loop body
LE: loop exit
PB: predicated region body
PF: predicated region fallthrough
CT: control target
= control target key end

     0   :  { %s354_s15 = smov 0   ;;  %s380_s0 = inlined_call_operand.vmem [shape: f32[2,8,64], index: 0, kind: input, shape index: {}]   ;;  %s381_s1 = inlined_call_operand.vmem [shape: f32[2,8,64], index: 1, kind: input, shape index: {}]   ;;  %s382_s2 = inlined_call_operand.vmem [shape: f32[2,64], index: 2, kind: input, shape index: {}]   ;;  %s383_s3 = inlined_call_operand.vmem [shape: f32[2,64], index: 3, kind: input, shape index: {}]   ;;  %s384_s4 = inlined_call_operand.vmem [shape: f32[2,8,64], index: 4, kind: output, shape index: {}]  }
   0x1 LB: > { %s303_s16 = sadd.s32 4294967295, %s327_s15   ;;  %p307_p0 = scmp.ge.s32.totalorder %s327_s15, 1  ;;  %s327_s15 = sphi %s354_s15, %s14_s15  }
   0x2   : > { %p170_p1 = scmp.lt.s32.totalorder %s327_s15, 3 }
   0x4   : > { %p171_p2 = pnand %p307_p0, %p170_p1 }
   0x5   : > { %p198_p3 = scmp.lt.s32.totalorder (!%p171_p2), %s303_s16, 1  ;;  %v213_v0 = vlaneseq (!%p171_p2)  ;;  %v210_v2 = vld [vmem:[%s382_s2] sm:$0x3] (!%p171_p2)  ;;  %vm236_vm0 = vcmask (!%p171_p2), 523264  }
   0x6   : > { %174 = sbr.rel (%p171_p2) target bundleno = 28 (0x1c), region = 36  ;;  %v211_v3 = vld [vmem:[%s383_s3] sm:$0x3] (!%p171_p2) }
   0x7   : > { %v214_v1 = vshrl.u32 (!%p171_p2), %v213_v0, 7 }
   0x9   : > { %v215_v4 = vsub.s32 (!%p171_p2), 0, %v214_v1  ;;  %v220_v5 = vsub.s32 (!%p171_p2), 1, %v214_v1 }
   0xb   : > { %v216_v7 = vrot.slane (!%p171_p2), %v210_v2, %v215_v4  ;;  %v221_v8 = vrot.slane (!%p171_p2), %v210_v2, %v220_v5  ;;  %v227_v10 = vrot.slane (!%p171_p2), %v211_v3, %v215_v4  ;;  %v233_v14 = vrot.slane (!%p171_p2), %v211_v3, %v220_v5 }
   0xd   : > { %s386_s16 = smov (!%p198_p3, %s303_s16), 1 }
   0xe   : > { %s308_s21 = sshll.u32 %s386_s16, 3 }
   0xf   : > { %s201_s24 = scalar_lea.vmem %s380_s0, %s308_s21  ;;  %s205_s27 = scalar_lea.vmem %s381_s1, %s308_s21 }
  0x10   : > { %v212_v6 = vld [vmem:[%s201_s24] sm:$0xff]  ;;  %s209_s30 = scalar_lea.vmem %s384_s4, %s308_s21 }
  0x11   : > { %v223_v9 = vld [vmem:[%s205_s27] sm:$0xff]  ;;  %v217_v11 = vmul.f32 %v216_v7, %v212_v6 }
  0x12   : > { %v228_v12 = vmul.f32 %v227_v10, %v223_v9 }
  0x13   : > { %v222_v13 = vadd.f32 %v221_v8, %v217_v11 }
  0x15   : > { %v229_v15 = vadd.f32 %v228_v12, %v222_v13 }
  0x17   : > { %v234_v16 = vadd.f32 %v233_v14, %v229_v15 }
  0x19   : > { %v235_v17 = vmax.f32 %v234_v16, 0.0 }
  0x1b   : > { %237 = vst.msk [vmem:[%s209_s30] sm:$0xff] %vm236_vm0, %v235_v17 }
  0x1c PF: > { %s14_s15 = sadd.s32 1, %s327_s15  }
  0x1d   : > { %p11_p4 = scmp.ge.s32.totalorder %s14_s15, 4  }
  0x1f   :  { %13 = sbr.rel (!%p11_p4) target bundleno = 1 (0x1), region = 69 }

</bundles_post_ra>
